<compile_context>
chip_gen: v7x
topology: tpu7x:2x2x1
jax: 0.10.0
libtpu: 0.0.40
codegen_flags: <defaults>
</compile_context>

<pallas_src>
import math

import jax
import jax.numpy as jnp
from jax import lax
from jax.experimental import pallas as pl
from jax.experimental.pallas import tpu as pltpu


def _make_kernels(H, W, Cp, dot_dtype):
    HW = H * W
    slope = 0.1

    def _coords():
        # (1, HW) h/w coordinates for flat lane index m = h*W + w.
        lane = lax.broadcasted_iota(jnp.int32, (1, HW), 1)
        if W & (W - 1) == 0:
            ww = jnp.bitwise_and(lane, W - 1)
            hh = jnp.right_shift(lane, W.bit_length() - 1)
        else:
            ww = lane % W
            hh = lane // W
        return hh, ww

    def _bn_lrelu(y, a):
        # Per-channel affine (precomputed scale/shift) + LeakyReLU(0.1).
        out = y * a[:, 0:1] + a[:, 1:2]
        return jnp.where(out >= 0.0, out, slope * out)

    def _conv3x3(y, w_ref, bias):
        # 3x3 SAME conv via im2col: 9 shifted (XLU roll) + boundary-masked
        # taps stacked on the contraction axis, one MXU dot, f32 accumulate.
        hh, ww = _coords()
        yd = y.astype(dot_dtype)
        rows = []
        for dh in (-1, 0, 1):
            if dh == -1:
                row_mask = hh >= 1
            elif dh == 1:
                row_mask = hh < H - 1
            else:
                row_mask = None
            for dw in (-1, 0, 1):
                mask = row_mask
                if dw == -1:
                    cm = ww >= 1
                    mask = cm if mask is None else jnp.logical_and(mask, cm)
                elif dw == 1:
                    cm = ww < W - 1
                    mask = cm if mask is None else jnp.logical_and(mask, cm)
                s = dh * W + dw                       # flat tap offset
                tap = yd if s == 0 else pltpu.roll(yd, shift=(-s) % HW, axis=1)
                if mask is not None:
                    tap = jnp.where(mask, tap, 0.0)   # (1,HW) mask broadcasts
                rows.append(tap)
        slab = jnp.concatenate(rows, axis=0)          # (9*Cp, HW)
        acc = jnp.dot(w_ref[...], slab, preferred_element_type=jnp.float32)
        return acc + bias

    def stats_kernel(x_ref, part_ref):
        # Per-image per-channel sum / sum-of-squares partials for BN1.
        x = x_ref[...]                                # (Cp, HW)
        part_ref[:, 0:1] = jnp.sum(x, axis=1, keepdims=True)
        part_ref[:, 1:2] = jnp.sum(x * x, axis=1, keepdims=True)

    def conv1_kernel(x_ref, a1_ref, w1_ref, c1_ref, part_ref):
        a1 = a1_ref[...]                              # (Cp, 3)
        y1 = _bn_lrelu(x_ref[...], a1)
        c1 = _conv3x3(y1, w1_ref, a1[:, 2:3])
        c1_ref[...] = c1
        part_ref[:, 0:1] = jnp.sum(c1, axis=1, keepdims=True)
        part_ref[:, 1:2] = jnp.sum(c1 * c1, axis=1, keepdims=True)

    def conv2_kernel(x_ref, c1_ref, a2_ref, w2_ref, o_ref):
        a2 = a2_ref[...]                              # (Cp, 3)
        y2 = _bn_lrelu(c1_ref[...], a2)
        c2 = _conv3x3(y2, w2_ref, a2[:, 2:3])
        o_ref[...] = x_ref[...] + c2                  # residual add

    return stats_kernel, conv1_kernel, conv2_kernel


def residual_block(x, g1, b1, w1, cb1, g2, b2, w2, cb2,
                   conv_dot_dtype=jnp.float32):
    N, C, H, W = x.shape
    HW = H * W
    Cp = max(8, ((C + 7) // 8) * 8)   # channels padded to sublane tile
    eps = 1e-5
    cnt = float(N * HW)               # BN count per channel

    # Layout plumbing: free reshape NCHW -> (N, C, HW); pad channels with
    # zeros (no-op at production C=64).  Padded channels stay exactly zero
    # through BN / LeakyReLU / conv and are dropped at the end.
    xr = x.reshape(N, C, HW).astype(jnp.float32)
    if Cp != C:
        xr = jnp.pad(xr, ((0, 0), (0, Cp - C), (0, 0)))

    def padc(v):
        v = v.astype(jnp.float32)
        return jnp.pad(v, (0, Cp - C)) if Cp != C else v

    def pack_w(w):
        # (O, I, 3, 3) -> (Cp, 9*Cp): columns grouped by tap t = kh*3+kw then
        # input channel, matching the im2col slab row order.
        w9 = jnp.transpose(w, (2, 3, 0, 1)).reshape(9, C, C)
        w9 = jnp.pad(w9, ((0, 0), (0, Cp - C), (0, Cp - C)))
        return jnp.transpose(w9, (1, 0, 2)).reshape(Cp, 9 * Cp).astype(conv_dot_dtype)

    stats_kernel, conv1_kernel, conv2_kernel = _make_kernels(H, W, Cp, conv_dot_dtype)

    img_spec = pl.BlockSpec((None, Cp, HW), lambda n: (n, 0, 0))
    stat_spec = pl.BlockSpec((None, Cp, 2), lambda n: (n, 0, 0))
    par_spec = pl.BlockSpec((Cp, 3), lambda n: (0, 0))        # VMEM-resident
    w_spec = pl.BlockSpec((Cp, 9 * Cp), lambda n: (0, 0))     # VMEM-resident
    parallel = pltpu.CompilerParams(dimension_semantics=("parallel",))
    # NOTE: per-image tiles are ~Cp*HW*4B (4 MiB at production C=64,H=W=128);
    # default scoped VMEM covers the toy shape, raise vmem_limit_bytes when
    # scaling up.

    # Pass A: BN1 partial stats per image.
    part1 = pl.pallas_call(
        stats_kernel,
        grid=(N,),
        in_specs=[img_spec],
        out_specs=stat_spec,
        out_shape=jax.ShapeDtypeStruct((N, Cp, 2), jnp.float32),
        compiler_params=parallel,
    )(xr)

    def bn_affine(sums, gamma, beta):
        mean = sums[:, 0] / cnt
        var = jnp.maximum(sums[:, 1] / cnt - mean * mean, 0.0)
        scale = gamma * jax.lax.rsqrt(var + eps)
        return scale, beta - mean * scale

    s1, t1 = bn_affine(jnp.sum(part1, axis=0), padc(g1), padc(b1))
    a1 = jnp.stack([s1, t1, padc(cb1)], axis=1)               # (Cp, 3)

    # Pass B: BN1 + LeakyReLU + conv1, plus BN2 partial stats.
    c1, part2 = pl.pallas_call(
        conv1_kernel,
        grid=(N,),
        in_specs=[img_spec, par_spec, w_spec],
        out_specs=(img_spec, stat_spec),
        out_shape=(jax.ShapeDtypeStruct((N, Cp, HW), jnp.float32),
                   jax.ShapeDtypeStruct((N, Cp, 2), jnp.float32)),
        compiler_params=parallel,
    )(xr, a1, pack_w(w1))

    s2, t2 = bn_affine(jnp.sum(part2, axis=0), padc(g2), padc(b2))
    a2 = jnp.stack([s2, t2, padc(cb2)], axis=1)               # (Cp, 3)

    # Pass C: BN2 + LeakyReLU + conv2 + residual add.
    out = pl.pallas_call(
        conv2_kernel,
        grid=(N,),
        in_specs=[img_spec, img_spec, par_spec, w_spec],
        out_specs=img_spec,
        out_shape=jax.ShapeDtypeStruct((N, Cp, HW), jnp.float32),
        compiler_params=parallel,
    )(xr, c1, a2, pack_w(w2))

    return out[:, :C, :].reshape(N, C, H, W)


# --------------------------- pure-JAX reference -------------------------------
def _bn_train(x, g, b, eps=1e-5):
    m = jnp.mean(x, axis=(0, 2, 3), keepdims=True)
    v = jnp.mean((x - m) ** 2, axis=(0, 2, 3), keepdims=True)
    return (x - m) / jnp.sqrt(v + eps) * g[None, :, None, None] + b[None, :, None, None]


def _lrelu(x):
    return jnp.where(x >= 0, x, 0.1 * x)


def _conv3x3_ref(x, w, b):
    y = jax.lax.conv_general_dilated(
        x, w, window_strides=(1, 1), padding="SAME",
        dimension_numbers=("NCHW", "OIHW", "NCHW"))
    return y + b[None, :, None, None]


def residual_block_ref(x, g1, b1, w1, cb1, g2, b2, w2, cb2):
    out = _conv3x3_ref(_lrelu(_bn_train(x, g1, b1)), w1, cb1)
    out = _conv3x3_ref(_lrelu(_bn_train(out, g2, b2)), w2, cb2)
    return x + out


if __name__ == "__main__":
    N, C, H, W = 2, 4, 16, 16
    key = jax.random.PRNGKey(0)
    ks = jax.random.split(key, 9)

    # Deterministic synthetic parameters (shapes follow nn.BatchNorm2d(C) /
    # nn.Conv2d(C, C, 3, padding=1)).
    g1 = (1.0 + 0.1 * jax.random.normal(ks[0], (C,))).astype(jnp.float32)
    b1 = (0.1 * jax.random.normal(ks[1], (C,))).astype(jnp.float32)
    g2 = (1.0 + 0.1 * jax.random.normal(ks[2], (C,))).astype(jnp.float32)
    b2 = (0.1 * jax.random.normal(ks[3], (C,))).astype(jnp.float32)

    bound = 1.0 / math.sqrt(C * 3 * 3)
    w1 = jax.random.uniform(ks[4], (C, C, 3, 3), jnp.float32, -bound, bound)
    cb1 = jax.random.uniform(ks[5], (C,), jnp.float32, -bound, bound)
    w2 = jax.random.uniform(ks[6], (C, C, 3, 3), jnp.float32, -bound, bound)
    cb2 = jax.random.uniform(ks[7], (C,), jnp.float32, -bound, bound)

    x = jax.random.normal(ks[8], (N, C, H, W), jnp.float32)

    fn = jax.jit(residual_block)
    out = fn(x, g1, b1, w1, cb1, g2, b2, w2, cb2)
    out = jax.block_until_ready(out)

    ref = residual_block_ref(x, g1, b1, w1, cb1, g2, b2, w2, cb2)
    assert out.shape == ref.shape and out.dtype == ref.dtype
    # 5e-3 tolerance leaves headroom for MXU rounding in the im2col dots.
    assert jnp.allclose(out, ref, atol=5e-3, rtol=5e-3), (
        float(jnp.max(jnp.abs(out - ref))))

    print("KERNEL_OK")
</pallas_src>

<mosaic_0001>
module attributes {stable_mosaic.version = 11 : i64} {
  func.func @stats_kernel(%arg0: i32, %arg1: memref<1x8x256xf32, #tpu.memory_space<vmem>>, %arg2: memref<1x8x2xf32, #tpu.memory_space<vmem>>) attributes {dimension_semantics = [#tpu.dimension_semantics<parallel>], iteration_bounds = array<i64: 2>, scalar_prefetch = 0 : i64, scratch_operands = 0 : i64, tpu.core_type = #tpu.core_type<tc>, window_params = [{transform_indices = @transform_0, window_bounds = array<i64: 1, 8, 256>}, {transform_indices = @transform_1, window_bounds = array<i64: 1, 8, 2>}]} {
    %c0 = arith.constant 0 : index
    %c0_0 = arith.constant 0 : index
    %c0_1 = arith.constant 0 : index
    %0 = vector.load %arg1[%c0, %c0_0, %c0_1] : memref<1x8x256xf32, #tpu.memory_space<vmem>>, vector<1x8x256xf32>
    %1 = vector.shape_cast %0 : vector<1x8x256xf32> to vector<8x256xf32>
    %cst = arith.constant dense<0.000000e+00> : vector<8xf32>
    %2 = vector.multi_reduction <add>, %1, %cst [1] : vector<8x256xf32> to vector<8xf32>
    %3 = vector.shape_cast %2 : vector<8xf32> to vector<8x1xf32>
    %c0_2 = arith.constant 0 : index
    %c0_3 = arith.constant 0 : index
    %c0_4 = arith.constant 0 : index
    %4 = vector.load %arg2[%c0_2, %c0_3, %c0_4] : memref<1x8x2xf32, #tpu.memory_space<vmem>>, vector<1x8x1xf32>
    %5 = vector.shape_cast %4 : vector<1x8x1xf32> to vector<8x1xf32>
    %6 = vector.shape_cast %3 : vector<8x1xf32> to vector<1x8x1xf32>
    tpu.vector_store %arg2[%c0_2, %c0_3, %c0_4], %6 {strides = array<i32>} : memref<1x8x2xf32, #tpu.memory_space<vmem>>, vector<1x8x1xf32>,
    %7 = arith.mulf %1, %1 : vector<8x256xf32>
    %cst_5 = arith.constant dense<0.000000e+00> : vector<8xf32>
    %8 = vector.multi_reduction <add>, %7, %cst_5 [1] : vector<8x256xf32> to vector<8xf32>
    %9 = vector.shape_cast %8 : vector<8xf32> to vector<8x1xf32>
    %c0_6 = arith.constant 0 : index
    %c0_7 = arith.constant 0 : index
    %c1 = arith.constant 1 : index
    %10 = vector.load %arg2[%c0_6, %c0_7, %c1] : memref<1x8x2xf32, #tpu.memory_space<vmem>>, vector<1x8x1xf32>
    %11 = vector.shape_cast %10 : vector<1x8x1xf32> to vector<8x1xf32>
    %12 = vector.shape_cast %9 : vector<8x1xf32> to vector<1x8x1xf32>
    tpu.vector_store %arg2[%c0_6, %c0_7, %c1], %12 {strides = array<i32>} : memref<1x8x2xf32, #tpu.memory_space<vmem>>, vector<1x8x1xf32>,
    return
  }
  func.func @transform_0(%arg0: i32) -> (i32, i32, i32) {
    %c0_i32 = arith.constant 0 : i32
    %c0_i32_0 = arith.constant 0 : i32
    %c0_i32_1 = arith.constant 0 : i32
    return %arg0, %c0_i32, %c0_i32_0 : i32, i32, i32
  }
  func.func @transform_1(%arg0: i32) -> (i32, i32, i32) {
    %c0_i32 = arith.constant 0 : i32
    %c0_i32_0 = arith.constant 0 : i32
    %c0_i32_1 = arith.constant 0 : i32
    return %arg0, %c0_i32, %c0_i32_0 : i32, i32, i32
  }
}

module attributes {stable_mosaic.version = 11 : i64} {
  func.func @conv1_kernel(%arg0: i32, %arg1: memref<1x8x256xf32, #tpu.memory_space<vmem>>, %arg2: memref<8x3xf32, #tpu.memory_space<vmem>>, %arg3: memref<8x72xf32, #tpu.memory_space<vmem>>, %arg4: memref<1x8x256xf32, #tpu.memory_space<vmem>>, %arg5: memref<1x8x2xf32, #tpu.memory_space<vmem>>) attributes {dimension_semantics = [#tpu.dimension_semantics<parallel>], iteration_bounds = array<i64: 2>, scalar_prefetch = 0 : i64, scratch_operands = 0 : i64, tpu.core_type = #tpu.core_type<tc>, window_params = [{transform_indices = @transform_0, window_bounds = array<i64: 1, 8, 256>}, {pipeline_mode = #tpu.pipeline_mode<synchronous>, transform_indices = @transform_1, window_bounds = array<i64: 8, 3>}, {pipeline_mode = #tpu.pipeline_mode<synchronous>, transform_indices = @transform_2, window_bounds = array<i64: 8, 72>}, {transform_indices = @transform_3, window_bounds = array<i64: 1, 8, 256>}, {transform_indices = @transform_4, window_bounds = array<i64: 1, 8, 2>}]} {
    %c0 = arith.constant 0 : index
    %c0_0 = arith.constant 0 : index
    %0 = vector.load %arg2[%c0, %c0_0] : memref<8x3xf32, #tpu.memory_space<vmem>>, vector<8x3xf32>
    %c0_1 = arith.constant 0 : index
    %c0_2 = arith.constant 0 : index
    %c0_3 = arith.constant 0 : index
    %1 = vector.load %arg1[%c0_1, %c0_2, %c0_3] : memref<1x8x256xf32, #tpu.memory_space<vmem>>, vector<1x8x256xf32>
    %2 = vector.shape_cast %1 : vector<1x8x256xf32> to vector<8x256xf32>
    %3 = vector.extract_strided_slice %0 {offsets = [0, 0], sizes = [8, 1], strides = [1, 1]} : vector<8x3xf32> to vector<8x1xf32>
    %4 = vector.broadcast %3 : vector<8x1xf32> to vector<8x256xf32>
    %5 = arith.mulf %2, %4 : vector<8x256xf32>
    %6 = vector.extract_strided_slice %0 {offsets = [0, 1], sizes = [8, 1], strides = [1, 1]} : vector<8x3xf32> to vector<8x1xf32>
    %7 = vector.broadcast %6 : vector<8x1xf32> to vector<8x256xf32>
    %8 = arith.addf %5, %7 : vector<8x256xf32>
    %cst = arith.constant 0.000000e+00 : f32
    %9 = vector.broadcast %cst : f32 to vector<8x256xf32>
    %10 = arith.cmpf oge, %8, %9 : vector<8x256xf32>
    %cst_4 = arith.constant 1.000000e-01 : f32
    %11 = vector.broadcast %cst_4 : f32 to vector<8x256xf32>
    %12 = arith.mulf %11, %8 : vector<8x256xf32>
    %13 = arith.select %10, %8, %12 : vector<8x256xi1>, vector<8x256xf32>
    %14 = vector.extract_strided_slice %0 {offsets = [0, 2], sizes = [8, 1], strides = [1, 1]} : vector<8x3xf32> to vector<8x1xf32>
    %15 = tpu.iota {dimensions = array<i32: 1>} : vector<1x256xi32>
    %c15_i32 = arith.constant 15 : i32
    %16 = vector.broadcast %c15_i32 : i32 to vector<1x256xi32>
    %17 = arith.andi %15, %16 : vector<1x256xi32>
    %c4_i32 = arith.constant 4 : i32
    %18 = vector.broadcast %c4_i32 : i32 to vector<1x256xi32>
    %19 = arith.shrsi %15, %18 : vector<1x256xi32>
    %c1_i32 = arith.constant 1 : i32
    %20 = vector.broadcast %c1_i32 : i32 to vector<1x256xi32>
    %21 = arith.cmpi sge, %19, %20 : vector<1x256xi32>
    %c1_i32_5 = arith.constant 1 : i32
    %22 = vector.broadcast %c1_i32_5 : i32 to vector<1x256xi32>
    %23 = arith.cmpi sge, %17, %22 : vector<1x256xi32>
    %24 = arith.andi %21, %23 : vector<1x256xi1>
    %c17_i32 = arith.constant 17 : i32
    %25 = tpu.dynamic_rotate %13 by %c17_i32 dim 1 : vector<8x256xf32>, i32 -> vector<8x256xf32>
    %cst_6 = arith.constant 0.000000e+00 : f32
    %26 = vector.shape_cast %24 : vector<1x256xi1> to vector<1x256xi1>
    %27 = vector.broadcast %26 : vector<1x256xi1> to vector<8x256xi1>
    %28 = vector.broadcast %cst_6 : f32 to vector<8x256xf32>
    %29 = arith.select %27, %25, %28 : vector<8x256xi1>, vector<8x256xf32>
    %c16_i32 = arith.constant 16 : i32
    %30 = tpu.dynamic_rotate %13 by %c16_i32 dim 1 : vector<8x256xf32>, i32 -> vector<8x256xf32>
    %cst_7 = arith.constant 0.000000e+00 : f32
    %31 = vector.shape_cast %21 : vector<1x256xi1> to vector<1x256xi1>
    %32 = vector.broadcast %31 : vector<1x256xi1> to vector<8x256xi1>
    %33 = vector.broadcast %cst_7 : f32 to vector<8x256xf32>
    %34 = arith.select %32, %30, %33 : vector<8x256xi1>, vector<8x256xf32>
    %c15_i32_8 = arith.constant 15 : i32
    %35 = vector.broadcast %c15_i32_8 : i32 to vector<1x256xi32>
    %36 = arith.cmpi slt, %17, %35 : vector<1x256xi32>
    %37 = arith.andi %21, %36 : vector<1x256xi1>
    %c15_i32_9 = arith.constant 15 : i32
    %38 = tpu.dynamic_rotate %13 by %c15_i32_9 dim 1 : vector<8x256xf32>, i32 -> vector<8x256xf32>
    %cst_10 = arith.constant 0.000000e+00 : f32
    %39 = vector.shape_cast %37 : vector<1x256xi1> to vector<1x256xi1>
    %40 = vector.broadcast %39 : vector<1x256xi1> to vector<8x256xi1>
    %41 = vector.broadcast %cst_10 : f32 to vector<8x256xf32>
    %42 = arith.select %40, %38, %41 : vector<8x256xi1>, vector<8x256xf32>
    %c1_i32_11 = arith.constant 1 : i32
    %43 = vector.broadcast %c1_i32_11 : i32 to vector<1x256xi32>
    %44 = arith.cmpi sge, %17, %43 : vector<1x256xi32>
    %c1_i32_12 = arith.constant 1 : i32
    %45 = tpu.dynamic_rotate %13 by %c1_i32_12 dim 1 : vector<8x256xf32>, i32 -> vector<8x256xf32>
    %cst_13 = arith.constant 0.000000e+00 : f32
    %46 = vector.shape_cast %44 : vector<1x256xi1> to vector<1x256xi1>
    %47 = vector.broadcast %46 : vector<1x256xi1> to vector<8x256xi1>
    %48 = vector.broadcast %cst_13 : f32 to vector<8x256xf32>
    %49 = arith.select %47, %45, %48 : vector<8x256xi1>, vector<8x256xf32>
    %c15_i32_14 = arith.constant 15 : i32
    %50 = vector.broadcast %c15_i32_14 : i32 to vector<1x256xi32>
    %51 = arith.cmpi slt, %17, %50 : vector<1x256xi32>
    %c255_i32 = arith.constant 255 : i32
    %52 = tpu.dynamic_rotate %13 by %c255_i32 dim 1 : vector<8x256xf32>, i32 -> vector<8x256xf32>
    %cst_15 = arith.constant 0.000000e+00 : f32
    %53 = vector.shape_cast %51 : vector<1x256xi1> to vector<1x256xi1>
    %54 = vector.broadcast %53 : vector<1x256xi1> to vector<8x256xi1>
    %55 = vector.broadcast %cst_15 : f32 to vector<8x256xf32>
    %56 = arith.select %54, %52, %55 : vector<8x256xi1>, vector<8x256xf32>
    %c15_i32_16 = arith.constant 15 : i32
    %57 = vector.broadcast %c15_i32_16 : i32 to vector<1x256xi32>
    %58 = arith.cmpi slt, %19, %57 : vector<1x256xi32>
    %c1_i32_17 = arith.constant 1 : i32
    %59 = vector.broadcast %c1_i32_17 : i32 to vector<1x256xi32>
    %60 = arith.cmpi sge, %17, %59 : vector<1x256xi32>
    %61 = arith.andi %58, %60 : vector<1x256xi1>
    %c241_i32 = arith.constant 241 : i32
    %62 = tpu.dynamic_rotate %13 by %c241_i32 dim 1 : vector<8x256xf32>, i32 -> vector<8x256xf32>
    %cst_18 = arith.constant 0.000000e+00 : f32
    %63 = vector.shape_cast %61 : vector<1x256xi1> to vector<1x256xi1>
    %64 = vector.broadcast %63 : vector<1x256xi1> to vector<8x256xi1>
    %65 = vector.broadcast %cst_18 : f32 to vector<8x256xf32>
    %66 = arith.select %64, %62, %65 : vector<8x256xi1>, vector<8x256xf32>
    %c240_i32 = arith.constant 240 : i32
    %67 = tpu.dynamic_rotate %13 by %c240_i32 dim 1 : vector<8x256xf32>, i32 -> vector<8x256xf32>
    %cst_19 = arith.constant 0.000000e+00 : f32
    %68 = vector.shape_cast %58 : vector<1x256xi1> to vector<1x256xi1>
    %69 = vector.broadcast %68 : vector<1x256xi1> to vector<8x256xi1>
    %70 = vector.broadcast %cst_19 : f32 to vector<8x256xf32>
    %71 = arith.select %69, %67, %70 : vector<8x256xi1>, vector<8x256xf32>
    %c15_i32_20 = arith.constant 15 : i32
    %72 = vector.broadcast %c15_i32_20 : i32 to vector<1x256xi32>
    %73 = arith.cmpi slt, %17, %72 : vector<1x256xi32>
    %74 = arith.andi %58, %73 : vector<1x256xi1>
    %c239_i32 = arith.constant 239 : i32
    %75 = tpu.dynamic_rotate %13 by %c239_i32 dim 1 : vector<8x256xf32>, i32 -> vector<8x256xf32>
    %cst_21 = arith.constant 0.000000e+00 : f32
    %76 = vector.shape_cast %74 : vector<1x256xi1> to vector<1x256xi1>
    %77 = vector.broadcast %76 : vector<1x256xi1> to vector<8x256xi1>
    %78 = vector.broadcast %cst_21 : f32 to vector<8x256xf32>
    %79 = arith.select %77, %75, %78 : vector<8x256xi1>, vector<8x256xf32>
    %80 = tpu.concatenate %29, %34, %42, %49, %13, %56, %66, %71, %79 in 0 : vector<8x256xf32>, vector<8x256xf32>, vector<8x256xf32>, vector<8x256xf32>, vector<8x256xf32>, vector<8x256xf32>, vector<8x256xf32>, vector<8x256xf32>, vector<8x256xf32> -> vector<72x256xf32>
    %c0_22 = arith.constant 0 : index
    %c0_23 = arith.constant 0 : index
    %81 = vector.load %arg3[%c0_22, %c0_23] : memref<8x72xf32, #tpu.memory_space<vmem>>, vector<8x72xf32>
    %cst_24 = arith.constant dense<0.000000e+00> : vector<8x256xf32>
    %82 = tpu.matmul %81, %80, %cst_24 {dimension_numbers = #tpu.dot_dimension_numbers<[1], [0], [0], [1], [0, 0, 1, 1], [], []>} : vector<8x72xf32>, vector<72x256xf32>, vector<8x256xf32> -> vector<8x256xf32>
    %83 = vector.broadcast %14 : vector<8x1xf32> to vector<8x256xf32>
    %84 = arith.addf %82, %83 : vector<8x256xf32>
    %c0_25 = arith.constant 0 : index
    %c0_26 = arith.constant 0 : index
    %c0_27 = arith.constant 0 : index
    %85 = vector.load %arg4[%c0_25, %c0_26, %c0_27] : memref<1x8x256xf32, #tpu.memory_space<vmem>>, vector<1x8x256xf32>
    %86 = vector.shape_cast %85 : vector<1x8x256xf32> to vector<8x256xf32>
    %87 = vector.shape_cast %84 : vector<8x256xf32> to vector<1x8x256xf32>
    tpu.vector_store %arg4[%c0_25, %c0_26, %c0_27], %87 {strides = array<i32>} : memref<1x8x256xf32, #tpu.memory_space<vmem>>, vector<1x8x256xf32>,
    %cst_28 = arith.constant dense<0.000000e+00> : vector<8xf32>
    %88 = vector.multi_reduction <add>, %84, %cst_28 [1] : vector<8x256xf32> to vector<8xf32>
    %89 = vector.shape_cast %88 : vector<8xf32> to vector<8x1xf32>
    %c0_29 = arith.constant 0 : index
    %c0_30 = arith.constant 0 : index
    %c0_31 = arith.constant 0 : index
    %90 = vector.load %arg5[%c0_29, %c0_30, %c0_31] : memref<1x8x2xf32, #tpu.memory_space<vmem>>, vector<1x8x1xf32>
    %91 = vector.shape_cast %90 : vector<1x8x1xf32> to vector<8x1xf32>
    %92 = vector.shape_cast %89 : vector<8x1xf32> to vector<1x8x1xf32>
    tpu.vector_store %arg5[%c0_29, %c0_30, %c0_31], %92 {strides = array<i32>} : memref<1x8x2xf32, #tpu.memory_space<vmem>>, vector<1x8x1xf32>,
    %93 = arith.mulf %84, %84 : vector<8x256xf32>
    %cst_32 = arith.constant dense<0.000000e+00> : vector<8xf32>
    %94 = vector.multi_reduction <add>, %93, %cst_32 [1] : vector<8x256xf32> to vector<8xf32>
    %95 = vector.shape_cast %94 : vector<8xf32> to vector<8x1xf32>
    %c0_33 = arith.constant 0 : index
    %c0_34 = arith.constant 0 : index
    %c1 = arith.constant 1 : index
    %96 = vector.load %arg5[%c0_33, %c0_34, %c1] : memref<1x8x2xf32, #tpu.memory_space<vmem>>, vector<1x8x1xf32>
    %97 = vector.shape_cast %96 : vector<1x8x1xf32> to vector<8x1xf32>
    %98 = vector.shape_cast %95 : vector<8x1xf32> to vector<1x8x1xf32>
    tpu.vector_store %arg5[%c0_33, %c0_34, %c1], %98 {strides = array<i32>} : memref<1x8x2xf32, #tpu.memory_space<vmem>>, vector<1x8x1xf32>,
    return
  }
  func.func @transform_0(%arg0: i32) -> (i32, i32, i32) {
    %c0_i32 = arith.constant 0 : i32
    %c0_i32_0 = arith.constant 0 : i32
    %c0_i32_1 = arith.constant 0 : i32
    return %arg0, %c0_i32, %c0_i32_0 : i32, i32, i32
  }
  func.func @transform_1(%arg0: i32) -> (i32, i32) {
    %c0_i32 = arith.constant 0 : i32
    %c0_i32_0 = arith.constant 0 : i32
    %c0_i32_1 = arith.constant 0 : i32
    return %c0_i32, %c0_i32_0 : i32, i32
  }
  func.func @transform_2(%arg0: i32) -> (i32, i32) {
    %c0_i32 = arith.constant 0 : i32
    %c0_i32_0 = arith.constant 0 : i32
    %c0_i32_1 = arith.constant 0 : i32
    return %c0_i32, %c0_i32_0 : i32, i32
  }
  func.func @transform_3(%arg0: i32) -> (i32, i32, i32) {
    %c0_i32 = arith.constant 0 : i32
    %c0_i32_0 = arith.constant 0 : i32
    %c0_i32_1 = arith.constant 0 : i32
    return %arg0, %c0_i32, %c0_i32_0 : i32, i32, i32
  }
  func.func @transform_4(%arg0: i32) -> (i32, i32, i32) {
    %c0_i32 = arith.constant 0 : i32
    %c0_i32_0 = arith.constant 0 : i32
    %c0_i32_1 = arith.constant 0 : i32
    return %arg0, %c0_i32, %c0_i32_0 : i32, i32, i32
  }
}

module attributes {stable_mosaic.version = 11 : i64} {
  func.func @conv2_kernel(%arg0: i32, %arg1: memref<1x8x256xf32, #tpu.memory_space<vmem>>, %arg2: memref<1x8x256xf32, #tpu.memory_space<vmem>>, %arg3: memref<8x3xf32, #tpu.memory_space<vmem>>, %arg4: memref<8x72xf32, #tpu.memory_space<vmem>>, %arg5: memref<1x8x256xf32, #tpu.memory_space<vmem>>) attributes {dimension_semantics = [#tpu.dimension_semantics<parallel>], iteration_bounds = array<i64: 2>, scalar_prefetch = 0 : i64, scratch_operands = 0 : i64, tpu.core_type = #tpu.core_type<tc>, window_params = [{transform_indices = @transform_0, window_bounds = array<i64: 1, 8, 256>}, {transform_indices = @transform_1, window_bounds = array<i64: 1, 8, 256>}, {pipeline_mode = #tpu.pipeline_mode<synchronous>, transform_indices = @transform_2, window_bounds = array<i64: 8, 3>}, {pipeline_mode = #tpu.pipeline_mode<synchronous>, transform_indices = @transform_3, window_bounds = array<i64: 8, 72>}, {transform_indices = @transform_4, window_bounds = array<i64: 1, 8, 256>}]} {
    %c0 = arith.constant 0 : index
    %c0_0 = arith.constant 0 : index
    %0 = vector.load %arg3[%c0, %c0_0] : memref<8x3xf32, #tpu.memory_space<vmem>>, vector<8x3xf32>
    %c0_1 = arith.constant 0 : index
    %c0_2 = arith.constant 0 : index
    %c0_3 = arith.constant 0 : index
    %1 = vector.load %arg2[%c0_1, %c0_2, %c0_3] : memref<1x8x256xf32, #tpu.memory_space<vmem>>, vector<1x8x256xf32>
    %2 = vector.shape_cast %1 : vector<1x8x256xf32> to vector<8x256xf32>
    %3 = vector.extract_strided_slice %0 {offsets = [0, 0], sizes = [8, 1], strides = [1, 1]} : vector<8x3xf32> to vector<8x1xf32>
    %4 = vector.broadcast %3 : vector<8x1xf32> to vector<8x256xf32>
    %5 = arith.mulf %2, %4 : vector<8x256xf32>
    %6 = vector.extract_strided_slice %0 {offsets = [0, 1], sizes = [8, 1], strides = [1, 1]} : vector<8x3xf32> to vector<8x1xf32>
    %7 = vector.broadcast %6 : vector<8x1xf32> to vector<8x256xf32>
    %8 = arith.addf %5, %7 : vector<8x256xf32>
    %cst = arith.constant 0.000000e+00 : f32
    %9 = vector.broadcast %cst : f32 to vector<8x256xf32>
    %10 = arith.cmpf oge, %8, %9 : vector<8x256xf32>
    %cst_4 = arith.constant 1.000000e-01 : f32
    %11 = vector.broadcast %cst_4 : f32 to vector<8x256xf32>
    %12 = arith.mulf %11, %8 : vector<8x256xf32>
    %13 = arith.select %10, %8, %12 : vector<8x256xi1>, vector<8x256xf32>
    %14 = vector.extract_strided_slice %0 {offsets = [0, 2], sizes = [8, 1], strides = [1, 1]} : vector<8x3xf32> to vector<8x1xf32>
    %15 = tpu.iota {dimensions = array<i32: 1>} : vector<1x256xi32>
    %c15_i32 = arith.constant 15 : i32
    %16 = vector.broadcast %c15_i32 : i32 to vector<1x256xi32>
    %17 = arith.andi %15, %16 : vector<1x256xi32>
    %c4_i32 = arith.constant 4 : i32
    %18 = vector.broadcast %c4_i32 : i32 to vector<1x256xi32>
    %19 = arith.shrsi %15, %18 : vector<1x256xi32>
    %c1_i32 = arith.constant 1 : i32
    %20 = vector.broadcast %c1_i32 : i32 to vector<1x256xi32>
    %21 = arith.cmpi sge, %19, %20 : vector<1x256xi32>
    %c1_i32_5 = arith.constant 1 : i32
    %22 = vector.broadcast %c1_i32_5 : i32 to vector<1x256xi32>
    %23 = arith.cmpi sge, %17, %22 : vector<1x256xi32>
    %24 = arith.andi %21, %23 : vector<1x256xi1>
    %c17_i32 = arith.constant 17 : i32
    %25 = tpu.dynamic_rotate %13 by %c17_i32 dim 1 : vector<8x256xf32>, i32 -> vector<8x256xf32>
    %cst_6 = arith.constant 0.000000e+00 : f32
    %26 = vector.shape_cast %24 : vector<1x256xi1> to vector<1x256xi1>
    %27 = vector.broadcast %26 : vector<1x256xi1> to vector<8x256xi1>
    %28 = vector.broadcast %cst_6 : f32 to vector<8x256xf32>
    %29 = arith.select %27, %25, %28 : vector<8x256xi1>, vector<8x256xf32>
    %c16_i32 = arith.constant 16 : i32
    %30 = tpu.dynamic_rotate %13 by %c16_i32 dim 1 : vector<8x256xf32>, i32 -> vector<8x256xf32>
    %cst_7 = arith.constant 0.000000e+00 : f32
    %31 = vector.shape_cast %21 : vector<1x256xi1> to vector<1x256xi1>
    %32 = vector.broadcast %31 : vector<1x256xi1> to vector<8x256xi1>
    %33 = vector.broadcast %cst_7 : f32 to vector<8x256xf32>
    %34 = arith.select %32, %30, %33 : vector<8x256xi1>, vector<8x256xf32>
    %c15_i32_8 = arith.constant 15 : i32
    %35 = vector.broadcast %c15_i32_8 : i32 to vector<1x256xi32>
    %36 = arith.cmpi slt, %17, %35 : vector<1x256xi32>
    %37 = arith.andi %21, %36 : vector<1x256xi1>
    %c15_i32_9 = arith.constant 15 : i32
    %38 = tpu.dynamic_rotate %13 by %c15_i32_9 dim 1 : vector<8x256xf32>, i32 -> vector<8x256xf32>
    %cst_10 = arith.constant 0.000000e+00 : f32
    %39 = vector.shape_cast %37 : vector<1x256xi1> to vector<1x256xi1>
    %40 = vector.broadcast %39 : vector<1x256xi1> to vector<8x256xi1>
    %41 = vector.broadcast %cst_10 : f32 to vector<8x256xf32>
    %42 = arith.select %40, %38, %41 : vector<8x256xi1>, vector<8x256xf32>
    %c1_i32_11 = arith.constant 1 : i32
    %43 = vector.broadcast %c1_i32_11 : i32 to vector<1x256xi32>
    %44 = arith.cmpi sge, %17, %43 : vector<1x256xi32>
    %c1_i32_12 = arith.constant 1 : i32
    %45 = tpu.dynamic_rotate %13 by %c1_i32_12 dim 1 : vector<8x256xf32>, i32 -> vector<8x256xf32>
    %cst_13 = arith.constant 0.000000e+00 : f32
    %46 = vector.shape_cast %44 : vector<1x256xi1> to vector<1x256xi1>
    %47 = vector.broadcast %46 : vector<1x256xi1> to vector<8x256xi1>
    %48 = vector.broadcast %cst_13 : f32 to vector<8x256xf32>
    %49 = arith.select %47, %45, %48 : vector<8x256xi1>, vector<8x256xf32>
    %c15_i32_14 = arith.constant 15 : i32
    %50 = vector.broadcast %c15_i32_14 : i32 to vector<1x256xi32>
    %51 = arith.cmpi slt, %17, %50 : vector<1x256xi32>
    %c255_i32 = arith.constant 255 : i32
    %52 = tpu.dynamic_rotate %13 by %c255_i32 dim 1 : vector<8x256xf32>, i32 -> vector<8x256xf32>
    %cst_15 = arith.constant 0.000000e+00 : f32
    %53 = vector.shape_cast %51 : vector<1x256xi1> to vector<1x256xi1>
    %54 = vector.broadcast %53 : vector<1x256xi1> to vector<8x256xi1>
    %55 = vector.broadcast %cst_15 : f32 to vector<8x256xf32>
    %56 = arith.select %54, %52, %55 : vector<8x256xi1>, vector<8x256xf32>
    %c15_i32_16 = arith.constant 15 : i32
    %57 = vector.broadcast %c15_i32_16 : i32 to vector<1x256xi32>
    %58 = arith.cmpi slt, %19, %57 : vector<1x256xi32>
    %c1_i32_17 = arith.constant 1 : i32
    %59 = vector.broadcast %c1_i32_17 : i32 to vector<1x256xi32>
    %60 = arith.cmpi sge, %17, %59 : vector<1x256xi32>
    %61 = arith.andi %58, %60 : vector<1x256xi1>
    %c241_i32 = arith.constant 241 : i32
    %62 = tpu.dynamic_rotate %13 by %c241_i32 dim 1 : vector<8x256xf32>, i32 -> vector<8x256xf32>
    %cst_18 = arith.constant 0.000000e+00 : f32
    %63 = vector.shape_cast %61 : vector<1x256xi1> to vector<1x256xi1>
    %64 = vector.broadcast %63 : vector<1x256xi1> to vector<8x256xi1>
    %65 = vector.broadcast %cst_18 : f32 to vector<8x256xf32>
    %66 = arith.select %64, %62, %65 : vector<8x256xi1>, vector<8x256xf32>
    %c240_i32 = arith.constant 240 : i32
    %67 = tpu.dynamic_rotate %13 by %c240_i32 dim 1 : vector<8x256xf32>, i32 -> vector<8x256xf32>
    %cst_19 = arith.constant 0.000000e+00 : f32
    %68 = vector.shape_cast %58 : vector<1x256xi1> to vector<1x256xi1>
    %69 = vector.broadcast %68 : vector<1x256xi1> to vector<8x256xi1>
    %70 = vector.broadcast %cst_19 : f32 to vector<8x256xf32>
    %71 = arith.select %69, %67, %70 : vector<8x256xi1>, vector<8x256xf32>
    %c15_i32_20 = arith.constant 15 : i32
    %72 = vector.broadcast %c15_i32_20 : i32 to vector<1x256xi32>
    %73 = arith.cmpi slt, %17, %72 : vector<1x256xi32>
    %74 = arith.andi %58, %73 : vector<1x256xi1>
    %c239_i32 = arith.constant 239 : i32
    %75 = tpu.dynamic_rotate %13 by %c239_i32 dim 1 : vector<8x256xf32>, i32 -> vector<8x256xf32>
    %cst_21 = arith.constant 0.000000e+00 : f32
    %76 = vector.shape_cast %74 : vector<1x256xi1> to vector<1x256xi1>
    %77 = vector.broadcast %76 : vector<1x256xi1> to vector<8x256xi1>
    %78 = vector.broadcast %cst_21 : f32 to vector<8x256xf32>
    %79 = arith.select %77, %75, %78 : vector<8x256xi1>, vector<8x256xf32>
    %80 = tpu.concatenate %29, %34, %42, %49, %13, %56, %66, %71, %79 in 0 : vector<8x256xf32>, vector<8x256xf32>, vector<8x256xf32>, vector<8x256xf32>, vector<8x256xf32>, vector<8x256xf32>, vector<8x256xf32>, vector<8x256xf32>, vector<8x256xf32> -> vector<72x256xf32>
    %c0_22 = arith.constant 0 : index
    %c0_23 = arith.constant 0 : index
    %81 = vector.load %arg4[%c0_22, %c0_23] : memref<8x72xf32, #tpu.memory_space<vmem>>, vector<8x72xf32>
    %cst_24 = arith.constant dense<0.000000e+00> : vector<8x256xf32>
    %82 = tpu.matmul %81, %80, %cst_24 {dimension_numbers = #tpu.dot_dimension_numbers<[1], [0], [0], [1], [0, 0, 1, 1], [], []>} : vector<8x72xf32>, vector<72x256xf32>, vector<8x256xf32> -> vector<8x256xf32>
    %83 = vector.broadcast %14 : vector<8x1xf32> to vector<8x256xf32>
    %84 = arith.addf %82, %83 : vector<8x256xf32>
    %c0_25 = arith.constant 0 : index
    %c0_26 = arith.constant 0 : index
    %c0_27 = arith.constant 0 : index
    %85 = vector.load %arg1[%c0_25, %c0_26, %c0_27] : memref<1x8x256xf32, #tpu.memory_space<vmem>>, vector<1x8x256xf32>
    %86 = vector.shape_cast %85 : vector<1x8x256xf32> to vector<8x256xf32>
    %87 = arith.addf %86, %84 : vector<8x256xf32>
    %c0_28 = arith.constant 0 : index
    %c0_29 = arith.constant 0 : index
    %c0_30 = arith.constant 0 : index
    %88 = vector.load %arg5[%c0_28, %c0_29, %c0_30] : memref<1x8x256xf32, #tpu.memory_space<vmem>>, vector<1x8x256xf32>
    %89 = vector.shape_cast %88 : vector<1x8x256xf32> to vector<8x256xf32>
    %90 = vector.shape_cast %87 : vector<8x256xf32> to vector<1x8x256xf32>
    tpu.vector_store %arg5[%c0_28, %c0_29, %c0_30], %90 {strides = array<i32>} : memref<1x8x256xf32, #tpu.memory_space<vmem>>, vector<1x8x256xf32>,
    return
  }
  func.func @transform_0(%arg0: i32) -> (i32, i32, i32) {
    %c0_i32 = arith.constant 0 : i32
    %c0_i32_0 = arith.constant 0 : i32
    %c0_i32_1 = arith.constant 0 : i32
    return %arg0, %c0_i32, %c0_i32_0 : i32, i32, i32
  }
  func.func @transform_1(%arg0: i32) -> (i32, i32, i32) {
    %c0_i32 = arith.constant 0 : i32
    %c0_i32_0 = arith.constant 0 : i32
    %c0_i32_1 = arith.constant 0 : i32
    return %arg0, %c0_i32, %c0_i32_0 : i32, i32, i32
  }
  func.func @transform_2(%arg0: i32) -> (i32, i32) {
    %c0_i32 = arith.constant 0 : i32
    %c0_i32_0 = arith.constant 0 : i32
    %c0_i32_1 = arith.constant 0 : i32
    return %c0_i32, %c0_i32_0 : i32, i32
  }
  func.func @transform_3(%arg0: i32) -> (i32, i32) {
    %c0_i32 = arith.constant 0 : i32
    %c0_i32_0 = arith.constant 0 : i32
    %c0_i32_1 = arith.constant 0 : i32
    return %c0_i32, %c0_i32_0 : i32, i32
  }
  func.func @transform_4(%arg0: i32) -> (i32, i32, i32) {
    %c0_i32 = arith.constant 0 : i32
    %c0_i32_0 = arith.constant 0 : i32
    %c0_i32_1 = arith.constant 0 : i32
    return %arg0, %c0_i32, %c0_i32_0 : i32, i32, i32
  }
}

</mosaic_0001>

<bundles_post_ra>
// kernel: residual_block.3
= control target key start
LH: loop header
LB: loop body
LE: loop exit
PB: predicated region body
PF: predicated region fallthrough
CT: control target
= control target key end

     0   :  { %s219_s6 = smov 0   ;;  %s236_s0 = inlined_call_operand.vmem [shape: f32[2,8,256], index: 0, kind: input, shape index: {}]   ;;  %s237_s1 = inlined_call_operand.vmem [shape: f32[2,8,2], index: 1, kind: output, shape index: {}]  }
   0x1 LB: > { %s182_s7 = sadd.s32 4294967295, %s207_s6   ;;  %p186_p0 = scmp.ge.s32.totalorder %s207_s6, 1  ;;  %s207_s6 = sphi %s219_s6, %s11_s6  }
   0x2   : > { %p87_p1 = scmp.lt.s32.totalorder %s207_s6, 3 }
   0x4   : > { %p88_p2 = pnand %p186_p0, %p87_p1 }
   0x5   : > { %p106_p3 = scmp.lt.s32.totalorder (!%p88_p2), %s182_s7, 1  ;;  %vm120_vm0 = vcmask (!%p88_p2), 7168   ;;  %vm127_vm1 = vcmask (!%p88_p2), 15368  }
   0x6   : > { %91 = sbr.rel (%p88_p2) target bundleno = 166 (0xa6), region = 24 }
   0xd   : > { %s239_s7 = smov (!%p106_p3, %s182_s7), 1 }
   0xe   : > { %s192_s8 = sshll.u32 %s239_s7, 4  ;;  %s189_s12 = sshll.u32 %s239_s7, 3 }
   0xf   : > { %s110_s11 = scalar_lea.vmem %s236_s0, %s192_s8  ;;  %s114_s15 = scalar_lea.vmem %s237_s1, %s189_s12 }
  0x10   : > { %v115_v0 = vld [vmem:[%s110_s11] sm:$0xff]  ;;  %v116_v1 = vld [vmem:[%s110_s11 + $0x8] sm:$0xff] }
  0x11   : > { %v117_v2 = vadd.f32 %v116_v1, %v115_v0  ;;  %v122_v3 = vmul.f32 %v115_v0, %v115_v0  ;;  %v123_v4 = vmul.f32 %v116_v1, %v116_v1 }
  0x13   : > { %118 = vadd.xlane.f32.xlu0 %v117_v2  ;;  %v124_v5 = vadd.f32 %v123_v4, %v122_v3 }
  0x17   : > { %125 = vadd.xlane.f32.xlu0 %v124_v5 }
  0xa0   : > { %v119_v6 = vpop.xlane.xlu0 %118 }
  0xa1   : > { %121 = vst.msk [vmem:[%s114_s15] sm:$0xff] %vm120_vm0, %v119_v6 }
  0xa4   : > { %v126_v7 = vpop.xlane.xlu0 %125 }
  0xa5   : > { %128 = vst.msk [vmem:[%s114_s15] sm:$0xff] %vm127_vm1, %v126_v7 }
  0xa6 PF: > { %s11_s6 = sadd.s32 1, %s207_s6  }
  0xa7   : > { %p8_p4 = scmp.ge.s32.totalorder %s11_s6, 4  }
  0xa9   :  { %10 = sbr.rel (!%p8_p4) target bundleno = 1 (0x1), region = 54 }

// kernel: residual_block.5
= control target key start
LH: loop header
LB: loop body
LE: loop exit
PB: predicated region body
PF: predicated region fallthrough
CT: control target
= control target key end

     0   :  { %s682_s15 = smov 0   ;;  %s828_s0 = inlined_call_operand.vmem [shape: f32[2,8,256], index: 0, kind: input, shape index: {}]   ;;  %s829_s1 = inlined_call_operand.vmem [shape: f32[2,8,256], index: 1, kind: input, shape index: {}]   ;;  %s830_s2 = inlined_call_operand.vmem [shape: f32[8,3], index: 2, kind: input, shape index: {}]   ;;  %s831_s3 = inlined_call_operand.vmem [shape: f32[8,72], index: 3, kind: input, shape index: {}]   ;;  %s832_s4 = inlined_call_operand.vmem [shape: f32[2,8,256], index: 4, kind: output, shape index: {}]  }
   0x1 LB: > { %s520_s16 = sadd.s32 4294967295, %s642_s15   ;;  %p524_p0 = scmp.ge.s32.totalorder %s642_s15, 1  ;;  %s642_s15 = sphi %s682_s15, %s14_s15  }
   0x2   : > { %p172_p1 = scmp.lt.s32.totalorder %s642_s15, 3 }
   0x4   : > { %p173_p2 = pnand %p524_p0, %p172_p1 }
   0x5   : > { %v218_v0 = vld [vmem:[%s830_s2] sm:$0xff] (!%p173_p2)  ;;  %v644_v1 = vmov (!%p173_p2), 0   ;;  %v645_v2 = vmov (!%p173_p2), 1   ;;  %p203_p3 = scmp.lt.s32.totalorder (!%p173_p2), %s520_s16, 1  ;;  %s646_s23 = smov (!%p173_p2), 1   ;;  %v653_v16 = vmov (!%p173_p2), 0.0   ;;  %v240_v18 = vlaneseq (!%p173_p2) }
   0x6   : > { %176 = sbr.rel (%p173_p2) target bundleno = 507 (0x1fb), region = 36  ;;  %598 = vset.pattern.permute.xlu0 (!%p173_p2), %v644_v1  ;;  %s647_s24 = smov (!%p173_p2), 17   ;;  %440 = vmatprep.mubr.f32.mxu0 (!%p173_p2), %v653_v16  ;;  %v654_v17 = vmov (!%p173_p2), 2  }
   0x7   : > { %223 = vperm.xlu0 (!%p173_p2), %598, %v218_v0   ;;  %s648_s25 = smov (!%p173_p2), 113   ;;  %s649_s26 = smov (!%p173_p2), 16   ;;  %v707_v19 = vand.u32 (!%p173_p2), 127, %v240_v18 }
   0x8   : > { %s650_s27 = smov (!%p173_p2), 111   ;;  %s651_s28 = smov (!%p173_p2), 15  }
   0x9   : > { %s652_s29 = smov (!%p173_p2), 127   ;;  %s655_s30 = smov (!%p173_p2), 112   ;;  %v242_v20 = vadd.s32 (!%p173_p2), 128, %v707_v19  ;;  %v243_v23 = vand.u32 (!%p173_p2), 15, %v707_v19  ;;  %v245_v24 = vshra.s32 (!%p173_p2), %v707_v19, 4  ;;  %vm257_vm7 = vcmp.lt.s32.totalorder (!%p173_p2), %v707_v19, 17 }
   0xa   : > { %vm270_vm8 = vcmp.lt.s32.totalorder (!%p173_p2), %v707_v19, 16  ;;  %vm300_vm14 = vcmp.lt.s32.totalorder (!%p173_p2), %v707_v19, 1  ;;  %vm287_vm15 = vcmp.lt.s32.totalorder (!%p173_p2), %v707_v19, 15 }
   0xb   : > { %599 = vset.pattern.permute.xlu0 (!%p173_p2), %v645_v2  ;;  %v244_v21 = vand.u32 (!%p173_p2), 15, %v242_v20  ;;  %v246_v22 = vshra.s32 (!%p173_p2), %v242_v20, 4  ;;  %vm720_vm4 = vcmp.ge.s32.totalorder (!%p173_p2), %v245_v24, 1  ;;  %vm724_vm5 = vcmp.ge.s32.totalorder (!%p173_p2), %v243_v23, 1 }
   0xc   : > { %229 = vperm.xlu0 (!%p173_p2), %599, %v218_v0   ;;  %vm251_vm9 = vmand (!%p173_p2), %vm720_vm4, %vm724_vm5  ;;  %vm748_vm12 = vcmp.lt.s32.totalorder (!%p173_p2), %v243_v23, 15 }
   0xd   : > { %s854_s16 = smov (!%p203_p3, %s520_s16), 1  ;;  %vm712_vm2 = vcmp.ge.s32.totalorder %v246_v22, 1  ;;  %vm716_vm3 = vcmp.ge.s32.totalorder %v244_v21, 1  ;;  %vm738_vm10 = vcmp.lt.s32.totalorder %v244_v21, 15  ;;  %vm557_vm13 = vmpackc.low %vm720_vm4, %vm251_vm9 }
   0xe   : > { %s693_s19 = sshll.u32 %s854_s16, 4  ;;  %vm252_vm6 = vmand %vm712_vm2, %vm716_vm3 }
   0xf   : > { %s212_s22 = scalar_lea.vmem %s829_s1, %s693_s19  ;;  %vm744_vm11 = vmpackc.low %vm712_vm2, %vm252_vm6  ;;  %s207_s9 = scalar_lea.vmem %s828_s0, %s693_s19 }
  0x10   : > { %v219_v4 = vld [vmem:[%s212_s22] sm:$0xff]  ;;  %v220_v5 = vld [vmem:[%s212_s22 + $0x8] sm:$0xff]  ;;  %635 = vset.pattern.permute.xlu0 %v654_v17  ;;  %s217_s12 = scalar_lea.vmem %s832_s4, %s693_s19 }
  0x11   : > { %v367_v17 = vld [vmem:[%s831_s3] sm:$0xff] }
  0x12   : > { %v447_v21 = vld [vmem:[%s207_s9] sm:$0xff] }
  0x86   : > { %v224_v3 = vpop.permute.xlu0 %223 }
  0x87   : > { %v226_v6 = vmul.f32 %v224_v3, %v219_v4  ;;  %v227_v7 = vmul.f32 %v224_v3, %v220_v5 }
  0x8b   : > { %v230_v8 = vpop.permute.xlu0 %229 }
  0x8c   : > { %v232_v9 = vadd.f32 %v230_v8, %v226_v6  ;;  %v233_v10 = vadd.f32 %v230_v8, %v227_v7 }
  0x8e   : > { %vm234_vm0 = vcmp.ge.f32.partialorder %v232_v9, 0.0  ;;  %vm235_vm1 = vcmp.ge.f32.partialorder %v233_v10, 0.0  ;;  %v236_v11 = vmul.f32 0.1, %v232_v9  ;;  %v237_v12 = vmul.f32 0.1, %v233_v10 }
  0x90   : > { %v699_v13 = vsel %vm234_vm0, %v232_v9, %v236_v11  ;;  %v701_v14 = vsel %vm235_vm1, %v233_v10, %v237_v12  ;;  %vm282_vm0 = vmand %vm712_vm2, %vm738_vm10  ;;  %vm313_vm2 = vcmp.lt.s32.totalorder %v707_v19, 127 }
  0x91   : > { %v615_v15 = vpack.i.bf16 %v701_v14, %v699_v13  ;;  %vm281_vm1 = vmand %vm720_vm4, %vm748_vm12 }
  0x92   : > { %vm560_vm6 = vmpackc.low %vm716_vm3, %vm282_vm0 }
  0x93   : > { %616 = vrot.lane.b32.xlu0 %v615_v15, %s646_s23  ;;  %601 = vrot.lane.b32.xlu1 %v615_v15, %s647_s24  ;;  %vm563_vm4 = vmpackc.low %vm724_vm5, %vm281_vm1 }
  0x97   : > { %626 = vrot.lane.b32.xlu0 %v615_v15, %s648_s25  ;;  %606 = vrot.lane.b32.xlu1 %v615_v15, %s649_s26 }
  0x9b   : > { %354 = vrot.lane.b32.xlu0 %v699_v13, %s650_s27  ;;  %611 = vrot.lane.b32.xlu1 %v615_v15, %s651_s28 }
  0x9f   : > { %621 = vrot.lane.b32.xlu1 %v615_v15, %s652_s29  ;;  %369 = vperm.xlu0 %635, %v218_v0  }
  0xa3   : > { %631 = vrot.lane.b32.xlu1 %v615_v15, %s655_s30 }
  0xa7   : > { %356 = vrot.lane.b32.xlu1 %v701_v14, %s650_s27 }
 0x105   : > { %v602_v25 = vpop.permute.xlu1 %601  ;;  %v617_v30 = vpop.permute.xlu0 %616 }
 0x106   : > { %v604_v31 = vunpack.i.h.bf16 %v602_v25  ;;  %v603_v32 = vunpack.i.l.bf16 %v602_v25  ;;  %v619_v37 = vunpack.i.h.bf16 %v617_v30  ;;  %v618_v38 = vunpack.i.l.bf16 %v617_v30 }
 0x108   : > { %v258_v41 = vsel %vm257_vm7, %v603_v32, %v604_v31  ;;  %v259_v43 = vsel %vm257_vm7, %v604_v31, %v603_v32  ;;  %v301_v50 = vsel %vm300_vm14, %v618_v38, %v619_v37  ;;  %v302_v51 = vsel %vm300_vm14, %v619_v37, %v618_v38 }
 0x109   : > { %v607_v33 = vpop.permute.xlu1 %606  ;;  %v627_v54 = vpop.permute.xlu0 %626  ;;  %vm771_vm7 = vcmp.lt.s32.totalorder %v246_v22, 15  ;;  %vm330_vm14 = vcmp.lt.s32.totalorder %v707_v19, 113 }
 0x10a   : > { %v609_v34 = vunpack.i.h.bf16 %v607_v33  ;;  %v608_v35 = vunpack.i.l.bf16 %v607_v33  ;;  %v629_v63 = vunpack.i.h.bf16 %v627_v54  ;;  %v628_v0 = vunpack.i.l.bf16 %v627_v54  ;;  %vm325_vm0 = vmand %vm771_vm7, %vm716_vm3 }
 0x10b   : > { %vm358_vm3 = vcmp.lt.s32.totalorder %v707_v19, 111 }
 0x10c   : > { %v271_v42 = vsel %vm270_vm8, %v608_v35, %v609_v34  ;;  %v272_v44 = vsel %vm270_vm8, %v609_v34, %v608_v35  ;;  %vm656_vm8 = vmmov 1   ;;  %v331_v8 = vsel %vm330_vm14, %v628_v0, %v629_v63 }
 0x10d   : > { %v612_v45 = vpop.permute.xlu1 %611  ;;  %v553_v46 = vpack.c.bf16 %v271_v42, %v258_v41  ;;  %v556_v47 = vpack.c.bf16 %v272_v44, %v259_v43  ;;  %vm777_vm9 = vmpackc.low %vm738_vm10, %vm656_vm8  ;;  %v332_v9 = vsel %vm330_vm14, %v629_v63, %v628_v0  ;;  %v355_v15 = vpop.permute.xlu0 %354 }
 0x10e   : > { %v614_v48 = vunpack.i.h.bf16 %v612_v45  ;;  %v613_v49 = vunpack.i.l.bf16 %v612_v45 }
 0x10f   : > { %555 = vmatprep.subr.msk.bf16.mxu0 %vm744_vm11, %v553_v46  ;;  %vm781_vm11 = vcmp.lt.s32.totalorder %v245_v24, 15  ;;  %v448_v24 = vld [vmem:[%s207_s9 + $0x8] sm:$0xff] }
 0x110   : > { %v288_v52 = vsel %vm287_vm15, %v613_v49, %v614_v48  ;;  %v289_v53 = vsel %vm287_vm15, %v614_v48, %v613_v49  ;;  %558 = vmatpush1.bf16.msk.msra.mxu0 %vm557_vm13, %v556_v47  ;;  %vm569_vm13 = vmpackc.low %vm748_vm12, %vm656_vm8  ;;  %vm343_vm15 = vcmp.lt.s32.totalorder %v707_v19, 112  ;;  %vm372_vm8 = vcmask 588800  }
 0x111   : > { %v559_v55 = vpack.c.bf16 %v301_v50, %v288_v52  ;;  %v562_v56 = vpack.c.bf16 %v302_v51, %v289_v53  ;;  %v622_v57 = vpop.permute.xlu1 %621  ;;  %vm324_vm1 = vmand %vm781_vm11, %vm724_vm5 }
 0x112   : > { %v624_v58 = vunpack.i.h.bf16 %v622_v57  ;;  %v623_v59 = vunpack.i.l.bf16 %v622_v57  ;;  %vm575_vm5 = vmpackc.low %vm781_vm11, %vm324_vm1 }
 0x113   : > { %561 = vmatprep.subr.msk.bf16.mxu0 %vm560_vm6, %v559_v55  ;;  %vm572_vm6 = vmpackc.low %vm771_vm7, %vm325_vm0 }
 0x114   : > { %v314_v1 = vsel %vm313_vm2, %v623_v59, %v624_v58  ;;  %v315_v2 = vsel %vm313_vm2, %v624_v58, %v623_v59  ;;  %564 = vmatpush1.bf16.msk.msra.mxu0 %vm563_vm4, %v562_v56  ;;  %vm353_vm2 = vmand %vm771_vm7, %vm738_vm10 }
 0x115   : > { %v565_v3 = vpack.c.bf16 %v315_v2, %v701_v14  ;;  %v568_v4 = vpack.c.bf16 %v314_v1, %v699_v13  ;;  %v632_v5 = vpop.permute.xlu1 %631  ;;  %vm352_vm4 = vmand %vm781_vm11, %vm748_vm12 }
 0x116   : > { %v634_v6 = vunpack.i.h.bf16 %v632_v5  ;;  %v633_v7 = vunpack.i.l.bf16 %v632_v5 }
 0x117   : > { %567 = vmatprep.subr.msk.bf16.mxu0 %vm777_vm9, %v565_v3 }
 0x118   : > { %v344_v10 = vsel %vm343_vm15, %v633_v7, %v634_v6  ;;  %v345_v11 = vsel %vm343_vm15, %v634_v6, %v633_v7  ;;  %570 = vmatpush1.bf16.msk.msra.mxu0 %vm569_vm13, %v568_v4 }
 0x119   : > { %v571_v12 = vpack.c.bf16 %v345_v11, %v332_v9  ;;  %v574_v13 = vpack.c.bf16 %v344_v10, %v331_v8  ;;  %v357_v14 = vpop.permute.xlu1 %356 }
 0x11a   : > { %v360_v16 = vsel %vm358_vm3, %v357_v14, %v355_v15  ;;  %v359_v18 = vsel %vm358_vm3, %v355_v15, %v357_v14 }
 0x11b   : > { %573 = vmatprep.subr.msk.bf16.mxu0 %vm572_vm6, %v571_v12 }
 0x11c   : > { %576 = vmatpush1.bf16.msk.msra.mxu0 %vm575_vm5, %v574_v13 }
 0x11d   : > { %545 = vmatprep.subr.msk.mxu0 %vm353_vm2, %v360_v16 }
 0x11e   : > { %v370_v19 = vpop.permute.xlu0 %369 }
 0x120   : > { %546 = vmatpush1.msk.msra.mxu0 %vm352_vm4, %v359_v18 }
 0x121   : > { %547 = vmatmul.mubr.msk.f32.vlgmr.msra.gmra.mrb[0].mxu0 %vm372_vm8, %v367_v17 }
 0x1f4   : > { %v442_v20 = vpop.f32.mrb[0].mxu0 }
 0x1f5   : > { %v443_v22 = vadd.f32 %v442_v20, %v370_v19  ;;  %v444_v23 = vpop.f32.mrb[1].mxu0 }
 0x1f6   : > { %v445_v25 = vadd.f32 %v444_v23, %v370_v19 }
 0x1f7   : > { %v449_v26 = vadd.f32 %v447_v21, %v443_v22 }
 0x1f8   : > { %v450_v27 = vadd.f32 %v448_v24, %v445_v25 }
 0x1f9   : > { %451 = vst [vmem:[%s217_s12] sm:$0xff] %v449_v26 }
 0x1fa   : > { %452 = vst [vmem:[%s217_s12 + $0x8] sm:$0xff] %v450_v27 }
 0x1fb PF: > { %s14_s15 = sadd.s32 1, %s642_s15  }
 0x1fc   : > { %p11_p4 = scmp.ge.s32.totalorder %s14_s15, 4  }
 0x1fe   :  { %13 = sbr.rel (!%p11_p4) target bundleno = 1 (0x1), region = 69 }

// kernel: residual_block.4
= control target key start
LH: loop header
LB: loop body
LE: loop exit
PB: predicated region body
PF: predicated region fallthrough
CT: control target
= control target key end

     0   :  { %s698_s15 = smov 0   ;;  %s847_s0 = inlined_call_operand.vmem [shape: f32[2,8,256], index: 0, kind: input, shape index: {}]   ;;  %s848_s1 = inlined_call_operand.vmem [shape: f32[8,3], index: 1, kind: input, shape index: {}]   ;;  %s849_s2 = inlined_call_operand.vmem [shape: f32[8,72], index: 2, kind: input, shape index: {}]   ;;  %s850_s3 = inlined_call_operand.vmem [shape: f32[2,8,256], index: 3, kind: output, shape index: {0}]   ;;  %s851_s4 = inlined_call_operand.vmem [shape: f32[2,8,2], index: 4, kind: output, shape index: {1}]  }
   0x1 LB: > { %s538_s16 = sadd.s32 4294967295, %s658_s15   ;;  %p542_p0 = scmp.ge.s32.totalorder %s658_s15, 1  ;;  %s658_s15 = sphi %s698_s15, %s15_s15  }
   0x2   : > { %p165_p1 = scmp.lt.s32.totalorder %s658_s15, 3 }
   0x4   : > { %p166_p2 = pnand %p542_p0, %p165_p1 }
   0x5   : > { %v209_v0 = vld [vmem:[%s848_s1] sm:$0xff] (!%p166_p2)  ;;  %v660_v1 = vmov (!%p166_p2), 0   ;;  %v661_v2 = vmov (!%p166_p2), 1   ;;  %p195_p3 = scmp.lt.s32.totalorder (!%p166_p2), %s538_s16, 1  ;;  %s662_s23 = smov (!%p166_p2), 1   ;;  %v669_v16 = vmov (!%p166_p2), 0.0   ;;  %v231_v18 = vlaneseq (!%p166_p2) }
   0x6   : > { %169 = sbr.rel (%p166_p2) target bundleno = 651 (0x28b), region = 32  ;;  %614 = vset.pattern.permute.xlu0 (!%p166_p2), %v660_v1  ;;  %s663_s24 = smov (!%p166_p2), 17   ;;  %431 = vmatprep.mubr.f32.mxu0 (!%p166_p2), %v669_v16  ;;  %v670_v17 = vmov (!%p166_p2), 2  }
   0x7   : > { %214 = vperm.xlu0 (!%p166_p2), %614, %v209_v0   ;;  %s664_s25 = smov (!%p166_p2), 113   ;;  %s665_s26 = smov (!%p166_p2), 16   ;;  %v725_v19 = vand.u32 (!%p166_p2), 127, %v231_v18 }
   0x8   : > { %s666_s27 = smov (!%p166_p2), 111   ;;  %s667_s28 = smov (!%p166_p2), 15  }
   0x9   : > { %s668_s29 = smov (!%p166_p2), 127   ;;  %s671_s30 = smov (!%p166_p2), 112   ;;  %v233_v20 = vadd.s32 (!%p166_p2), 128, %v725_v19  ;;  %v234_v23 = vand.u32 (!%p166_p2), 15, %v725_v19  ;;  %v236_v24 = vshra.s32 (!%p166_p2), %v725_v19, 4  ;;  %vm248_vm7 = vcmp.lt.s32.totalorder (!%p166_p2), %v725_v19, 17 }
   0xa   : > { %vm261_vm8 = vcmp.lt.s32.totalorder (!%p166_p2), %v725_v19, 16  ;;  %vm291_vm14 = vcmp.lt.s32.totalorder (!%p166_p2), %v725_v19, 1  ;;  %vm278_vm15 = vcmp.lt.s32.totalorder (!%p166_p2), %v725_v19, 15 }
   0xb   : > { %615 = vset.pattern.permute.xlu0 (!%p166_p2), %v661_v2  ;;  %v235_v21 = vand.u32 (!%p166_p2), 15, %v233_v20  ;;  %v237_v22 = vshra.s32 (!%p166_p2), %v233_v20, 4  ;;  %vm738_vm4 = vcmp.ge.s32.totalorder (!%p166_p2), %v236_v24, 1  ;;  %vm742_vm5 = vcmp.ge.s32.totalorder (!%p166_p2), %v234_v23, 1 }
   0xc   : > { %220 = vperm.xlu0 (!%p166_p2), %615, %v209_v0   ;;  %vm242_vm9 = vmand (!%p166_p2), %vm738_vm4, %vm742_vm5  ;;  %vm766_vm12 = vcmp.lt.s32.totalorder (!%p166_p2), %v234_v23, 15 }
   0xd   : > { %s873_s16 = smov (!%p195_p3, %s538_s16), 1  ;;  %vm730_vm2 = vcmp.ge.s32.totalorder %v237_v22, 1  ;;  %vm734_vm3 = vcmp.ge.s32.totalorder %v235_v21, 1  ;;  %vm756_vm10 = vcmp.lt.s32.totalorder %v235_v21, 15  ;;  %vm573_vm13 = vmpackc.low %vm738_vm4, %vm242_vm9 }
   0xe   : > { %s567_s19 = sshll.u32 %s873_s16, 4  ;;  %vm243_vm6 = vmand %vm730_vm2, %vm734_vm3  ;;  %s547_s10 = sshll.u32 %s873_s16, 3 }
   0xf   : > { %s199_s22 = scalar_lea.vmem %s847_s0, %s567_s19  ;;  %vm762_vm11 = vmpackc.low %vm730_vm2, %vm243_vm6  ;;  %s204_s9 = scalar_lea.vmem %s850_s3, %s567_s19 }
  0x10   : > { %v210_v4 = vld [vmem:[%s199_s22] sm:$0xff]  ;;  %v211_v5 = vld [vmem:[%s199_s22 + $0x8] sm:$0xff]  ;;  %651 = vset.pattern.permute.xlu0 %v670_v17  ;;  %s208_s13 = scalar_lea.vmem %s851_s4, %s547_s10 }
  0x11   : > { %v358_v17 = vld [vmem:[%s849_s2] sm:$0xff] }
  0x86   : > { %v215_v3 = vpop.permute.xlu0 %214 }
  0x87   : > { %v217_v6 = vmul.f32 %v215_v3, %v210_v4  ;;  %v218_v7 = vmul.f32 %v215_v3, %v211_v5 }
  0x8b   : > { %v221_v8 = vpop.permute.xlu0 %220 }
  0x8c   : > { %v223_v9 = vadd.f32 %v221_v8, %v217_v6  ;;  %v224_v10 = vadd.f32 %v221_v8, %v218_v7 }
  0x8e   : > { %vm225_vm0 = vcmp.ge.f32.partialorder %v223_v9, 0.0  ;;  %vm226_vm1 = vcmp.ge.f32.partialorder %v224_v10, 0.0  ;;  %v227_v11 = vmul.f32 0.1, %v223_v9  ;;  %v228_v12 = vmul.f32 0.1, %v224_v10 }
  0x90   : > { %v717_v13 = vsel %vm225_vm0, %v223_v9, %v227_v11  ;;  %v719_v14 = vsel %vm226_vm1, %v224_v10, %v228_v12  ;;  %vm273_vm0 = vmand %vm730_vm2, %vm756_vm10  ;;  %vm304_vm2 = vcmp.lt.s32.totalorder %v725_v19, 127 }
  0x91   : > { %v631_v15 = vpack.i.bf16 %v719_v14, %v717_v13  ;;  %vm272_vm1 = vmand %vm738_vm4, %vm766_vm12 }
  0x92   : > { %vm576_vm6 = vmpackc.low %vm734_vm3, %vm273_vm0 }
  0x93   : > { %632 = vrot.lane.b32.xlu0 %v631_v15, %s662_s23  ;;  %617 = vrot.lane.b32.xlu1 %v631_v15, %s663_s24  ;;  %vm579_vm4 = vmpackc.low %vm742_vm5, %vm272_vm1 }
  0x97   : > { %642 = vrot.lane.b32.xlu0 %v631_v15, %s664_s25  ;;  %622 = vrot.lane.b32.xlu1 %v631_v15, %s665_s26 }
  0x9b   : > { %345 = vrot.lane.b32.xlu0 %v717_v13, %s666_s27  ;;  %627 = vrot.lane.b32.xlu1 %v631_v15, %s667_s28 }
  0x9f   : > { %637 = vrot.lane.b32.xlu1 %v631_v15, %s668_s29  ;;  %360 = vperm.xlu0 %651, %v209_v0  }
  0xa3   : > { %647 = vrot.lane.b32.xlu1 %v631_v15, %s671_s30 }
  0xa7   : > { %347 = vrot.lane.b32.xlu1 %v719_v14, %s666_s27 }
 0x105   : > { %v618_v25 = vpop.permute.xlu1 %617  ;;  %v633_v30 = vpop.permute.xlu0 %632 }
 0x106   : > { %v620_v31 = vunpack.i.h.bf16 %v618_v25  ;;  %v619_v32 = vunpack.i.l.bf16 %v618_v25  ;;  %v635_v37 = vunpack.i.h.bf16 %v633_v30  ;;  %v634_v38 = vunpack.i.l.bf16 %v633_v30 }
 0x108   : > { %v249_v41 = vsel %vm248_vm7, %v619_v32, %v620_v31  ;;  %v250_v43 = vsel %vm248_vm7, %v620_v31, %v619_v32  ;;  %v292_v50 = vsel %vm291_vm14, %v634_v38, %v635_v37  ;;  %v293_v51 = vsel %vm291_vm14, %v635_v37, %v634_v38 }
 0x109   : > { %v623_v33 = vpop.permute.xlu1 %622  ;;  %v643_v54 = vpop.permute.xlu0 %642  ;;  %vm789_vm7 = vcmp.lt.s32.totalorder %v237_v22, 15  ;;  %vm321_vm14 = vcmp.lt.s32.totalorder %v725_v19, 113 }
 0x10a   : > { %v625_v34 = vunpack.i.h.bf16 %v623_v33  ;;  %v624_v35 = vunpack.i.l.bf16 %v623_v33  ;;  %v645_v63 = vunpack.i.h.bf16 %v643_v54  ;;  %v644_v0 = vunpack.i.l.bf16 %v643_v54  ;;  %vm316_vm0 = vmand %vm789_vm7, %vm734_vm3 }
 0x10b   : > { %vm349_vm3 = vcmp.lt.s32.totalorder %v725_v19, 111 }
 0x10c   : > { %v262_v42 = vsel %vm261_vm8, %v624_v35, %v625_v34  ;;  %v263_v44 = vsel %vm261_vm8, %v625_v34, %v624_v35  ;;  %vm672_vm8 = vmmov 1   ;;  %v322_v8 = vsel %vm321_vm14, %v644_v0, %v645_v63 }
 0x10d   : > { %v628_v45 = vpop.permute.xlu1 %627  ;;  %v569_v46 = vpack.c.bf16 %v262_v42, %v249_v41  ;;  %v572_v47 = vpack.c.bf16 %v263_v44, %v250_v43  ;;  %vm795_vm9 = vmpackc.low %vm756_vm10, %vm672_vm8  ;;  %v323_v9 = vsel %vm321_vm14, %v645_v63, %v644_v0  ;;  %v346_v15 = vpop.permute.xlu0 %345 }
 0x10e   : > { %v630_v48 = vunpack.i.h.bf16 %v628_v45  ;;  %v629_v49 = vunpack.i.l.bf16 %v628_v45 }
 0x10f   : > { %571 = vmatprep.subr.msk.bf16.mxu0 %vm762_vm11, %v569_v46  ;;  %vm799_vm11 = vcmp.lt.s32.totalorder %v236_v24, 15 }
 0x110   : > { %v279_v52 = vsel %vm278_vm15, %v629_v49, %v630_v48  ;;  %v280_v53 = vsel %vm278_vm15, %v630_v48, %v629_v49  ;;  %574 = vmatpush1.bf16.msk.msra.mxu0 %vm573_vm13, %v572_v47  ;;  %vm585_vm13 = vmpackc.low %vm766_vm12, %vm672_vm8  ;;  %vm334_vm15 = vcmp.lt.s32.totalorder %v725_v19, 112  ;;  %vm363_vm8 = vcmask 588800  }
 0x111   : > { %v575_v55 = vpack.c.bf16 %v292_v50, %v279_v52  ;;  %v578_v56 = vpack.c.bf16 %v293_v51, %v280_v53  ;;  %v638_v57 = vpop.permute.xlu1 %637  ;;  %vm315_vm1 = vmand %vm799_vm11, %vm742_vm5 }
 0x112   : > { %v640_v58 = vunpack.i.h.bf16 %v638_v57  ;;  %v639_v59 = vunpack.i.l.bf16 %v638_v57  ;;  %vm591_vm5 = vmpackc.low %vm799_vm11, %vm315_vm1 }
 0x113   : > { %577 = vmatprep.subr.msk.bf16.mxu0 %vm576_vm6, %v575_v55  ;;  %vm588_vm6 = vmpackc.low %vm789_vm7, %vm316_vm0 }
 0x114   : > { %v305_v1 = vsel %vm304_vm2, %v639_v59, %v640_v58  ;;  %v306_v2 = vsel %vm304_vm2, %v640_v58, %v639_v59  ;;  %580 = vmatpush1.bf16.msk.msra.mxu0 %vm579_vm4, %v578_v56  ;;  %vm344_vm2 = vmand %vm789_vm7, %vm756_vm10  ;;  %vm443_vm10 = vcmask 7168  }
 0x115   : > { %v581_v3 = vpack.c.bf16 %v306_v2, %v719_v14  ;;  %v584_v4 = vpack.c.bf16 %v305_v1, %v717_v13  ;;  %v648_v5 = vpop.permute.xlu1 %647  ;;  %vm343_vm4 = vmand %vm799_vm11, %vm766_vm12  ;;  %vm450_vm12 = vcmask 15368  }
 0x116   : > { %v650_v6 = vunpack.i.h.bf16 %v648_v5  ;;  %v649_v7 = vunpack.i.l.bf16 %v648_v5 }
 0x117   : > { %583 = vmatprep.subr.msk.bf16.mxu0 %vm795_vm9, %v581_v3 }
 0x118   : > { %v335_v10 = vsel %vm334_vm15, %v649_v7, %v650_v6  ;;  %v336_v11 = vsel %vm334_vm15, %v650_v6, %v649_v7  ;;  %586 = vmatpush1.bf16.msk.msra.mxu0 %vm585_vm13, %v584_v4 }
 0x119   : > { %v587_v12 = vpack.c.bf16 %v336_v11, %v323_v9  ;;  %v590_v13 = vpack.c.bf16 %v335_v10, %v322_v8  ;;  %v348_v14 = vpop.permute.xlu1 %347 }
 0x11a   : > { %v351_v16 = vsel %vm349_vm3, %v348_v14, %v346_v15  ;;  %v350_v18 = vsel %vm349_vm3, %v346_v15, %v348_v14 }
 0x11b   : > { %589 = vmatprep.subr.msk.bf16.mxu0 %vm588_vm6, %v587_v12 }
 0x11c   : > { %592 = vmatpush1.bf16.msk.msra.mxu0 %vm591_vm5, %v590_v13 }
 0x11d   : > { %562 = vmatprep.subr.msk.mxu0 %vm344_vm2, %v351_v16 }
 0x11e   : > { %v361_v19 = vpop.permute.xlu0 %360 }
 0x120   : > { %563 = vmatpush1.msk.msra.mxu0 %vm343_vm4, %v350_v18 }
 0x121   : > { %564 = vmatmul.mubr.msk.f32.vlgmr.msra.gmra.mrb[0].mxu0 %vm363_vm8, %v358_v17 }
 0x1f4   : > { %v433_v20 = vpop.f32.mrb[0].mxu0 }
 0x1f5   : > { %v434_v21 = vadd.f32 %v433_v20, %v361_v19  ;;  %v435_v22 = vpop.f32.mrb[1].mxu0 }
 0x1f6   : > { %v436_v23 = vadd.f32 %v435_v22, %v361_v19 }
 0x1f7   : > { %438 = vst [vmem:[%s204_s9] sm:$0xff] %v434_v21  ;;  %v445_v24 = vmul.f32 %v434_v21, %v434_v21 }
 0x1f8   : > { %439 = vst [vmem:[%s204_s9 + $0x8] sm:$0xff] %v436_v23  ;;  %v440_v25 = vadd.f32 %v436_v23, %v434_v21  ;;  %v446_v26 = vmul.f32 %v436_v23, %v436_v23 }
 0x1fa   : > { %441 = vadd.xlane.f32.xlu1 %v440_v25  ;;  %v447_v27 = vadd.f32 %v446_v26, %v445_v24 }
 0x1fc   : > { %448 = vadd.xlane.f32.xlu0 %v447_v27 }
 0x287   : > { %v442_v28 = vpop.xlane.xlu1 %441 }
 0x288   : > { %444 = vst.msk [vmem:[%s208_s13] sm:$0xff] %vm443_vm10, %v442_v28 }
 0x289   : > { %v449_v29 = vpop.xlane.xlu0 %448 }
 0x28a   : > { %451 = vst.msk [vmem:[%s208_s13] sm:$0xff] %vm450_vm12, %v449_v29 }
 0x28b PF: > { %s15_s15 = sadd.s32 1, %s658_s15  }
 0x28c   : > { %p12_p4 = scmp.ge.s32.totalorder %s15_s15, 4  }
 0x28e   :  { %14 = sbr.rel (!%p12_p4) target bundleno = 1 (0x1), region = 74 }

</bundles_post_ra>
